<compile_context>
chip_gen: v7x
topology: tpu7x:2x2x1
jax: 0.10.0
libtpu: 0.0.40
codegen_flags: <defaults>
</compile_context>

<pallas_src>
import functools
import math

import jax
import jax.numpy as jnp
from jax.experimental import pallas as pl
from jax.experimental.pallas import tpu as pltpu

# ---- config (mirrors the PyTorch `config` dict; vocab_size irrelevant to MLP) ----
BATCH = 4
BLOCK = 8          # sequence length ("block_size")
N_EMBED = 16
HIDDEN = 4 * N_EMBED
DROPOUT_P = 0.3    # inference-mode dropout == identity

_INV_SQRT2 = 1.0 / math.sqrt(2.0)


def _round_up(x, m):
    return ((x + m - 1) // m) * m


def mlp_kernel(x_ref, w1_ref, b1_ref, w2_ref, b2_ref, o_ref):
    """Fused MLP tile: (x @ W1 + b1) -> exact GELU -> (@ W2 + b2).

    x_ref : (TM, EP)  bf16 row tile
    w1_ref: (EP, HP)  bf16 (VMEM-resident across grid steps)
    b1_ref: (1, HP)   f32
    w2_ref: (HP, EP)  bf16 (VMEM-resident across grid steps)
    b2_ref: (1, EP)   f32
    o_ref : (TM, EP)  f32
    """
    x = x_ref[...]                                                  # bf16
    # c_fc: bf16 x bf16 -> f32 accumulation on the MXU
    h = jnp.dot(x, w1_ref[...], preferred_element_type=jnp.float32) + b1_ref[...]
    # exact GELU (PyTorch nn.GELU default, approximate='none'); erf -> EUP slot
    h = 0.5 * h * (1.0 + jax.lax.erf(h * _INV_SQRT2))
    # c_proj: cast activated hidden to bf16 for the MXU, accumulate in f32
    o = jnp.dot(h.astype(jnp.bfloat16), w2_ref[...],
                preferred_element_type=jnp.float32) + b2_ref[...]
    # dropout: inference mode -> identity
    # TODO(synk): training-mode dropout (p=0.3) would use pltpu.prng_seed/prng_random_bits.
    o_ref[...] = o.astype(o_ref.dtype)


@functools.partial(jax.jit, static_argnames=("tm_max",))
def mlp_forward(x, w1, b1, w2, b2, *, tm_max=512):
    """x: (B, T, E) float32 -> (B, T, E) float32."""
    B, T, E = x.shape
    H = w1.shape[1]
    M = B * T

    EP = _round_up(E, 128)
    HP = _round_up(H, 128)
    TM = min(tm_max, _round_up(M, 8))       # 8-aligned row tile (256-512 at scale)
    MP = _round_up(M, TM)

    # ---- pad + cast (fused into this jitted program; bf16 MXU inputs, f32 biases) ----
    x2d = x.reshape(M, E)
    xp = jnp.zeros((MP, EP), jnp.bfloat16).at[:M, :E].set(x2d.astype(jnp.bfloat16))
    w1p = jnp.zeros((EP, HP), jnp.bfloat16).at[:E, :H].set(w1.astype(jnp.bfloat16))
    b1p = jnp.zeros((1, HP), jnp.float32).at[0, :H].set(b1)
    w2p = jnp.zeros((HP, EP), jnp.bfloat16).at[:H, :E].set(w2.astype(jnp.bfloat16))
    b2p = jnp.zeros((1, EP), jnp.float32).at[0, :E].set(b2)

    grid = (MP // TM,)

    cost = pl.CostEstimate(
        flops=2 * MP * (EP * HP + HP * EP),
        transcendentals=MP * HP,             # one erf per hidden activation
        bytes_accessed=(xp.size * 2 + w1p.size * 2 + w2p.size * 2
                        + b1p.size * 4 + b2p.size * 4 + MP * EP * 4),
    )

    outp = pl.pallas_call(
        mlp_kernel,
        out_shape=jax.ShapeDtypeStruct((MP, EP), jnp.float32),
        grid=grid,
        in_specs=[
            pl.BlockSpec((TM, EP), lambda i: (i, 0)),   # x: tiled over rows
            pl.BlockSpec((EP, HP), lambda i: (0, 0)),   # w1: resident
            pl.BlockSpec((1, HP),  lambda i: (0, 0)),   # b1: resident
            pl.BlockSpec((HP, EP), lambda i: (0, 0)),   # w2: resident
            pl.BlockSpec((1, EP),  lambda i: (0, 0)),   # b2: resident
        ],
        out_specs=pl.BlockSpec((TM, EP), lambda i: (i, 0)),
        compiler_params=pltpu.CompilerParams(
            dimension_semantics=("parallel",),   # shard row tiles across TCs (v7x)
            vmem_limit_bytes=64 << 20,           # headroom for resident weights at scale
        ),
        cost_estimate=cost,
    )(xp, w1p, b1p, w2p, b2p)

    return outp[:M, :E].reshape(B, T, E)


def init_params(key):
    """Deterministic init mimicking torch.nn.Linear defaults:
    U(-1/sqrt(fan_in), 1/sqrt(fan_in)) for both weight and bias."""
    k1, k2, k3, k4 = jax.random.split(key, 4)
    bound1 = 1.0 / math.sqrt(N_EMBED)
    bound2 = 1.0 / math.sqrt(HIDDEN)
    # stored as (in_features, out_features) so the kernel does x @ W
    w1 = jax.random.uniform(k1, (N_EMBED, HIDDEN), jnp.float32, -bound1, bound1)
    b1 = jax.random.uniform(k2, (HIDDEN,), jnp.float32, -bound1, bound1)
    w2 = jax.random.uniform(k3, (HIDDEN, N_EMBED), jnp.float32, -bound2, bound2)
    b2 = jax.random.uniform(k4, (N_EMBED,), jnp.float32, -bound2, bound2)
    return w1, b1, w2, b2


if __name__ == "__main__":
    key = jax.random.PRNGKey(0)
    kx, kp = jax.random.split(key)

    x = jax.random.normal(kx, (BATCH, BLOCK, N_EMBED), jnp.float32)
    w1, b1, w2, b2 = init_params(kp)

    out = mlp_forward(x, w1, b1, w2, b2)
    out = jax.block_until_ready(out)

    # Pure-JAX f32 reference (kernel feeds bf16 into the MXU with f32
    # accumulation, so tolerances are loosened vs. a full-f32 path).
    h_ref = x @ w1 + b1
    h_ref = 0.5 * h_ref * (1.0 + jax.lax.erf(h_ref / jnp.sqrt(2.0)))
    ref = h_ref @ w2 + b2

    assert out.shape == (BATCH, BLOCK, N_EMBED)
    assert jnp.allclose(out, ref, atol=2e-2, rtol=2e-2), (
        float(jnp.max(jnp.abs(out - ref))))
    print("KERNEL_OK")
</pallas_src>

<mosaic_0001>
module attributes {stable_mosaic.version = 11 : i64} {
  func.func @mlp_kernel(%arg0: i32, %arg1: memref<32x128xbf16, #tpu.memory_space<vmem>>, %arg2: memref<128x128xbf16, #tpu.memory_space<vmem>>, %arg3: memref<1x128xf32, #tpu.memory_space<vmem>>, %arg4: memref<128x128xbf16, #tpu.memory_space<vmem>>, %arg5: memref<1x128xf32, #tpu.memory_space<vmem>>, %arg6: memref<32x128xf32, #tpu.memory_space<vmem>>) attributes {dimension_semantics = [#tpu.dimension_semantics<parallel>], iteration_bounds = array<i64: 1>, scalar_prefetch = 0 : i64, scratch_operands = 0 : i64, tpu.core_type = #tpu.core_type<tc>, window_params = [{transform_indices = @transform_0, window_bounds = array<i64: 32, 128>}, {pipeline_mode = #tpu.pipeline_mode<synchronous>, transform_indices = @transform_1, window_bounds = array<i64: 128, 128>}, {pipeline_mode = #tpu.pipeline_mode<synchronous>, transform_indices = @transform_2, window_bounds = array<i64: 1, 128>}, {pipeline_mode = #tpu.pipeline_mode<synchronous>, transform_indices = @transform_3, window_bounds = array<i64: 128, 128>}, {pipeline_mode = #tpu.pipeline_mode<synchronous>, transform_indices = @transform_4, window_bounds = array<i64: 1, 128>}, {transform_indices = @transform_5, window_bounds = array<i64: 32, 128>}]} {
    %c0 = arith.constant 0 : index
    %c0_0 = arith.constant 0 : index
    %0 = vector.load %arg1[%c0, %c0_0] : memref<32x128xbf16, #tpu.memory_space<vmem>>, vector<32x128xbf16>
    %c0_1 = arith.constant 0 : index
    %c0_2 = arith.constant 0 : index
    %1 = vector.load %arg2[%c0_1, %c0_2] : memref<128x128xbf16, #tpu.memory_space<vmem>>, vector<128x128xbf16>
    %cst = arith.constant dense<0.000000e+00> : vector<32x128xf32>
    %2 = tpu.matmul %0, %1, %cst {dimension_numbers = #tpu.dot_dimension_numbers<[1], [0], [0], [1], [0, 0, 1, 1], [], []>} : vector<32x128xbf16>, vector<128x128xbf16>, vector<32x128xf32> -> vector<32x128xf32>
    %c0_3 = arith.constant 0 : index
    %c0_4 = arith.constant 0 : index
    %3 = vector.load %arg3[%c0_3, %c0_4] : memref<1x128xf32, #tpu.memory_space<vmem>>, vector<1x128xf32>
    %4 = vector.broadcast %3 : vector<1x128xf32> to vector<32x128xf32>
    %5 = arith.addf %2, %4 : vector<32x128xf32>
    %cst_5 = arith.constant 5.000000e-01 : f32
    %6 = vector.broadcast %cst_5 : f32 to vector<32x128xf32>
    %7 = arith.mulf %6, %5 : vector<32x128xf32>
    %cst_6 = arith.constant 0.707106769 : f32
    %8 = vector.broadcast %cst_6 : f32 to vector<32x128xf32>
    %9 = arith.mulf %5, %8 : vector<32x128xf32>
    %10 = math.erf %9 : vector<32x128xf32>
    %cst_7 = arith.constant 1.000000e+00 : f32
    %11 = vector.broadcast %cst_7 : f32 to vector<32x128xf32>
    %12 = arith.addf %11, %10 : vector<32x128xf32>
    %13 = arith.mulf %7, %12 : vector<32x128xf32>
    %14 = arith.truncf %13 : vector<32x128xf32> to vector<32x128xbf16>
    %c0_8 = arith.constant 0 : index
    %c0_9 = arith.constant 0 : index
    %15 = vector.load %arg4[%c0_8, %c0_9] : memref<128x128xbf16, #tpu.memory_space<vmem>>, vector<128x128xbf16>
    %cst_10 = arith.constant dense<0.000000e+00> : vector<32x128xf32>
    %16 = tpu.matmul %14, %15, %cst_10 {dimension_numbers = #tpu.dot_dimension_numbers<[1], [0], [0], [1], [0, 0, 1, 1], [], []>} : vector<32x128xbf16>, vector<128x128xbf16>, vector<32x128xf32> -> vector<32x128xf32>
    %c0_11 = arith.constant 0 : index
    %c0_12 = arith.constant 0 : index
    %17 = vector.load %arg5[%c0_11, %c0_12] : memref<1x128xf32, #tpu.memory_space<vmem>>, vector<1x128xf32>
    %18 = vector.broadcast %17 : vector<1x128xf32> to vector<32x128xf32>
    %19 = arith.addf %16, %18 : vector<32x128xf32>
    %c0_13 = arith.constant 0 : index
    %c0_14 = arith.constant 0 : index
    %20 = vector.load %arg6[%c0_13, %c0_14] : memref<32x128xf32, #tpu.memory_space<vmem>>, vector<32x128xf32>
    tpu.vector_store %arg6[%c0_13, %c0_14], %19 {strides = array<i32>} : memref<32x128xf32, #tpu.memory_space<vmem>>, vector<32x128xf32>,
    return
  }
  func.func @transform_0(%arg0: i32) -> (i32, i32) {
    %c0_i32 = arith.constant 0 : i32
    %c0_i32_0 = arith.constant 0 : i32
    return %arg0, %c0_i32 : i32, i32
  }
  func.func @transform_1(%arg0: i32) -> (i32, i32) {
    %c0_i32 = arith.constant 0 : i32
    %c0_i32_0 = arith.constant 0 : i32
    %c0_i32_1 = arith.constant 0 : i32
    return %c0_i32, %c0_i32_0 : i32, i32
  }
  func.func @transform_2(%arg0: i32) -> (i32, i32) {
    %c0_i32 = arith.constant 0 : i32
    %c0_i32_0 = arith.constant 0 : i32
    %c0_i32_1 = arith.constant 0 : i32
    return %c0_i32, %c0_i32_0 : i32, i32
  }
  func.func @transform_3(%arg0: i32) -> (i32, i32) {
    %c0_i32 = arith.constant 0 : i32
    %c0_i32_0 = arith.constant 0 : i32
    %c0_i32_1 = arith.constant 0 : i32
    return %c0_i32, %c0_i32_0 : i32, i32
  }
  func.func @transform_4(%arg0: i32) -> (i32, i32) {
    %c0_i32 = arith.constant 0 : i32
    %c0_i32_0 = arith.constant 0 : i32
    %c0_i32_1 = arith.constant 0 : i32
    return %c0_i32, %c0_i32_0 : i32, i32
  }
  func.func @transform_5(%arg0: i32) -> (i32, i32) {
    %c0_i32 = arith.constant 0 : i32
    %c0_i32_0 = arith.constant 0 : i32
    return %arg0, %c0_i32 : i32, i32
  }
}

</mosaic_0001>

<bundles_post_ra>
// kernel: mlp_forward.1
= control target key start
LH: loop header
LB: loop body
LE: loop exit
PB: predicated region body
PF: predicated region fallthrough
CT: control target
= control target key end

     0   :  { %10 = vsyncpa [#allocation3], 0  ;;  %s771_s0 = inlined_call_operand.hbm [shape: bf16[32,128], index: 0, kind: input, shape index: {}]   ;;  %s772_s1 = inlined_call_operand.hbm [shape: bf16[128,128], index: 1, kind: input, shape index: {}]   ;;  %s773_s2 = inlined_call_operand.hbm [shape: f32[1,128], index: 2, kind: input, shape index: {}]   ;;  %s774_s3 = inlined_call_operand.hbm [shape: bf16[128,128], index: 3, kind: input, shape index: {}]   ;;  %s775_s4 = inlined_call_operand.hbm [shape: f32[1,128], index: 4, kind: input, shape index: {}]   ;;  %s776_s5 = inlined_call_operand.hbm [shape: f32[32,128], index: 5, kind: output, shape index: {}]  }
   0x1   :  { %11 = vsyncpa [#allocation6], 0 }
   0x2   :  { %12 = vsyncpa [#allocation9], 0 }
   0x3   :  { %13 = vsyncpa [#allocation4], 0  ;;  %s643_s18 = smov [#allocation5]   ;;  %s644_s20 = smov [#allocation8]  }
   0x4   :  { %s31_s19 = sshll.u32 %s643_s18, 4  ;;  %s53_s21 = sshll.u32 %s644_s20, 4  ;;  %s32_s19 = int_to_ptr.vmem [resolvable:$true] %s31_s19  ;;  %s683_s21 = int_to_ptr.vmem [resolvable:$true] %s53_s21 }
   0x5   :  { %s503_s24 = scalar_lea.hbm %s772_s1, 1024 }
   0x6   :  { %p504_p0 = scmp.ne.s32.totalorder %s772_s1, %s503_s24  ;;  %p507_p1 = scmp.lt.u32.totalorder %s503_s24, %s772_s1 }
   0x8   :  { %p509_p2 = pnand %p507_p1, %p504_p0 }
   0xa   :  { %512 = shalt.err (!%p509_p2)
}
   0xb   :  { %s513_s29 = scalar_lea.vmem %s32_s19, 1024  ;;  %p518_p4 = scmp.lt.s32.totalorder %s32_s19, %s32_s19 }
   0xc   :  { %p514_p3 = scmp.ne.s32.totalorder %s32_s19, %s513_s29  ;;  %p519_p5 = scmp.lt.s32.totalorder %s513_s29, %s513_s29 }
   0xe   :  { %p520_p6 = por %p519_p5, %p518_p4 }
  0x10   :  { %p521_p7 = pnand %p520_p6, %p514_p3 }
  0x12   :  { %524 = shalt.err (!%p521_p7)
}
  0x13   :  { %s645_s30 = smov 64   ;;  %s646_s6 = smov 4  }
  0x14   :  { %37 = dma.hbm_to_vmem [thread:$0]  %s772_s1, 1024, %s32_s19, [#allocation6], %s645_s30, %s645_s30, %s646_s6  }
  0x15   :  { %s525_s11 = scalar_lea.hbm %s774_s3, 1024 }
  0x16   :  { %p526_p8 = scmp.ne.s32.totalorder %s774_s3, %s525_s11  ;;  %p529_p9 = scmp.lt.u32.totalorder %s525_s11, %s774_s3 }
  0x18   :  { %p531_p10 = pnand %p529_p9, %p526_p8 }
  0x1a   :  { %534 = shalt.err (!%p531_p10)
}
  0x1b   :  { %s535_s16 = scalar_lea.vmem %s683_s21, 1024  ;;  %p540_p12 = scmp.lt.s32.totalorder %s683_s21, %s683_s21 }
  0x1c   :  { %p536_p11 = scmp.ne.s32.totalorder %s683_s21, %s535_s16  ;;  %p541_p13 = scmp.lt.s32.totalorder %s535_s16, %s535_s16 }
  0x1e   :  { %p542_p0 = por %p541_p13, %p540_p12 }
  0x20   :  { %p543_p1 = pnand %p542_p0, %p536_p11 }
  0x22   :  { %546 = shalt.err (!%p543_p1)
}
  0x23   :  { %59 = dma.hbm_to_vmem [thread:$0]  %s774_s3, 1024, %s683_s21, [#allocation9], %s645_s30, %s645_s30, %s646_s6  }
  0x24   :  { %s647_s18 = smov [#allocation2]   ;;  %s648_s20 = smov [#allocation7]  }
  0x25   :  { %s19_s19 = sshll.u32 %s647_s18, 4  ;;  %s44_s22 = sshll.u32 %s648_s20, 4  ;;  %s20_s19 = int_to_ptr.vmem [resolvable:$true] %s19_s19  ;;  %s45_s22 = int_to_ptr.vmem [resolvable:$true] %s44_s22 }
  0x26   :  { %s547_s25 = scalar_lea.hbm %s771_s0, 256 }
  0x27   :  { %p548_p2 = scmp.ne.s32.totalorder %s771_s0, %s547_s25  ;;  %p551_p3 = scmp.lt.u32.totalorder %s547_s25, %s771_s0 }
  0x29   :  { %p553_p4 = pnand %p551_p3, %p548_p2 }
  0x2b   :  { %556 = shalt.err (!%p553_p4)
}
  0x2c   :  { %s557_s3 = scalar_lea.vmem %s20_s19, 256  ;;  %p562_p6 = scmp.lt.s32.totalorder %s20_s19, %s20_s19 }
  0x2d   :  { %p558_p5 = scmp.ne.s32.totalorder %s20_s19, %s557_s3  ;;  %p563_p7 = scmp.lt.s32.totalorder %s557_s3, %s557_s3 }
  0x2f   :  { %p564_p8 = por %p563_p7, %p562_p6 }
  0x31   :  { %p565_p9 = pnand %p564_p8, %p558_p5 }
  0x33   :  { %568 = shalt.err (!%p565_p9)
}
  0x34   :  { %25 = dma.hbm_to_vmem [thread:$0]  %s771_s0, 256, %s20_s19, [#allocation3], %s645_s30, %s645_s30, %s646_s6  }
  0x35   :  { %s569_s10 = scalar_lea.hbm %s773_s2, 16 }
  0x36   :  { %p570_p10 = scmp.ne.s32.totalorder %s773_s2, %s569_s10  ;;  %p573_p11 = scmp.lt.u32.totalorder %s569_s10, %s773_s2 }
  0x38   :  { %p575_p12 = pnand %p573_p11, %p570_p10 }
  0x3a   :  { %578 = shalt.err (!%p575_p12)
}
  0x3b   :  { %s579_s15 = scalar_lea.vmem %s45_s22, 16  ;;  %s583_s16 = scalar_lea.vmem %s45_s22, 32 }
  0x3c   :  { %p580_p13 = scmp.ne.s32.totalorder %s45_s22, %s579_s15  ;;  %p584_p0 = scmp.lt.s32.totalorder %s45_s22, %s45_s22 }
  0x3d   :  { %p585_p1 = scmp.lt.s32.totalorder %s583_s16, %s579_s15 }
  0x3f   :  { %p586_p2 = por %p585_p1, %p584_p0 }
  0x41   :  { %p587_p3 = pnand %p586_p2, %p580_p13 }
  0x43   :  { %590 = shalt.err (!%p587_p3)
}
  0x44   :  { %47 = dma.hbm_to_vmem [thread:$0]  %s773_s2, 16, %s45_s22, [#allocation6]  }
  0x45   :  { %s649_s6 = smov [#allocation10]   ;;  %s591_s19 = scalar_lea.hbm %s775_s4, 16 }
  0x46   :  { %s66_s1 = sshll.u32 %s649_s6, 4  ;;  %p592_p4 = scmp.ne.s32.totalorder %s775_s4, %s591_s19  ;;  %s67_s1 = int_to_ptr.vmem [resolvable:$true] %s66_s1 }
  0x47   :  { %p595_p5 = scmp.lt.u32.totalorder %s591_s19, %s775_s4 }
  0x49   :  { %p597_p6 = pnand %p595_p5, %p592_p4 }
  0x4b   :  { %600 = shalt.err (!%p597_p6)
}
  0x4c   :  { %s601_s26 = scalar_lea.vmem %s67_s1, 16  ;;  %s605_s2 = scalar_lea.vmem %s67_s1, 32 }
  0x4d   :  { %p602_p7 = scmp.ne.s32.totalorder %s67_s1, %s601_s26  ;;  %p606_p8 = scmp.lt.s32.totalorder %s67_s1, %s67_s1 }
  0x4e   :  { %p607_p9 = scmp.lt.s32.totalorder %s605_s2, %s601_s26 }
  0x50   :  { %p608_p10 = por %p607_p9, %p606_p8 }
  0x52   :  { %p609_p11 = pnand %p608_p10, %p602_p7 }
  0x54   :  { %612 = shalt.err (!%p609_p11)
}
  0x55   :  { %69 = dma.hbm_to_vmem [thread:$0]  %s775_s4, 16, %s67_s1, [#allocation9]  }
  0x56   :  { %635 = dma.done.wait [#allocation3], 256  }
  0x57   :  { %636 = vsyncadd [#allocation3], 4294967040 }
  0x58   :  { %637 = dma.done.wait [#allocation6], 1040  }
  0x59   :  { %638 = vsyncadd [#allocation6], 4294966256 }
  0x5a   :  { %639 = dma.done.wait [#allocation9], 1040  }
  0x5b   :  { %640 = vsyncadd [#allocation9], 4294966256  ;;  %v477_v0 = vld [vmem:[#allocation5] sm:$0xff]   ;;  %v478_v1 = vld [vmem:[#allocation5 + $0x8] sm:$0xff]   ;;  %s650_s4 = smov [#allocation11]  }
  0x5c   :  { %427 = vmatprep.subr.bf16.mxu0 %v477_v0  ;;  %v479_v2 = vld [vmem:[#allocation5 + $0x10] sm:$0xff]   ;;  %v480_v3 = vld [vmem:[#allocation5 + $0x18] sm:$0xff]   ;;  %v481_v5 = vld [vmem:[#allocation5 + $0x20] sm:$0xff]   ;;  %s373_s28 = sshll.u32 %s650_s4, 4  ;;  %s374_s28 = int_to_ptr.vmem [resolvable:$true] %s373_s28 }
  0x5d   :  { %428 = vmatpush3.bf16.msra.mxu0 %v477_v0  ;;  %v485_v4 = vld [vmem:[#allocation2] sm:$0xff]   ;;  %v487_v6 = vld [vmem:[#allocation8] sm:$0xff]   ;;  %v484_v10 = vld [vmem:[#allocation5 + $0x38] sm:$0xff]   ;;  %s613_s29 = scalar_lea.vmem %s374_s28, 512  ;;  %p618_p13 = scmp.lt.s32.totalorder %s374_s28, %s374_s28 }
  0x5e   :  { %429 = vmatprep.subr.bf16.mxu0 %v478_v1  ;;  %443 = vmatprep.mubr.bf16.mxu0 %v485_v4  ;;  %v488_v7 = vld [vmem:[#allocation8 + $0x8] sm:$0xff]   ;;  %v486_v11 = vld [vmem:[#allocation2 + $0x8] sm:$0xff]   ;;  %v491_v14 = vld [vmem:[#allocation8 + $0x20] sm:$0xff]   ;;  %p614_p12 = scmp.ne.s32.totalorder %s374_s28, %s613_s29  ;;  %p619_p0 = scmp.lt.s32.totalorder %s613_s29, %s613_s29 }
  0x5f   :  { %447 = vmatprep.subr.bf16.mxu1 %v487_v6  ;;  %v482_v8 = vld [vmem:[#allocation5 + $0x28] sm:$0xff]   ;;  %v483_v9 = vld [vmem:[#allocation5 + $0x30] sm:$0xff]   ;;  %v490_v13 = vld [vmem:[#allocation8 + $0x18] sm:$0xff]  }
  0x60   :  { %448 = vmatpush3.bf16.msra.mxu1 %v487_v6  ;;  %v489_v12 = vld [vmem:[#allocation8 + $0x10] sm:$0xff]   ;;  %v492_v15 = vld [vmem:[#allocation8 + $0x28] sm:$0xff]   ;;  %v494_v17 = vld [vmem:[#allocation8 + $0x38] sm:$0xff]   ;;  %p620_p1 = por %p619_p0, %p618_p13 }
  0x61   :  { %430 = vmatpush3.bf16.msra.mxu0 %v478_v1  ;;  %449 = vmatprep.subr.bf16.mxu1 %v488_v7  ;;  %v493_v16 = vld [vmem:[#allocation8 + $0x30] sm:$0xff]   ;;  %v387_v18 = vld [vmem:[#allocation7] ss:$0 sm:$0xff]  ;;  %v398_v49 = vld [vmem:[#allocation10] ss:$0 sm:$0xff] }
  0x62   :  { %431 = vmatprep.subr.bf16.mxu0 %v479_v2  ;;  %p621_p2 = pnand %p620_p1, %p614_p12 }
  0x64   :  { %450 = vmatpush3.bf16.msra.mxu1 %v488_v7 }
  0x65   :  { %432 = vmatpush3.bf16.msra.mxu0 %v479_v2  ;;  %451 = vmatprep.subr.bf16.mxu1 %v489_v12 }
  0x66   :  { %433 = vmatprep.subr.bf16.mxu0 %v480_v3 }
  0x68   :  { %452 = vmatpush3.bf16.msra.mxu1 %v489_v12 }
  0x69   :  { %434 = vmatpush3.bf16.msra.mxu0 %v480_v3  ;;  %453 = vmatprep.subr.bf16.mxu1 %v490_v13 }
  0x6a   :  { %435 = vmatprep.subr.bf16.mxu0 %v481_v5 }
  0x6c   :  { %454 = vmatpush3.bf16.msra.mxu1 %v490_v13 }
  0x6d   :  { %436 = vmatpush3.bf16.msra.mxu0 %v481_v5  ;;  %455 = vmatprep.subr.bf16.mxu1 %v491_v14 }
  0x6e   :  { %437 = vmatprep.subr.bf16.mxu0 %v482_v8 }
  0x70   :  { %456 = vmatpush3.bf16.msra.mxu1 %v491_v14 }
  0x71   :  { %438 = vmatpush3.bf16.msra.mxu0 %v482_v8  ;;  %457 = vmatprep.subr.bf16.mxu1 %v492_v15 }
  0x72   :  { %439 = vmatprep.subr.bf16.mxu0 %v483_v9 }
  0x74   :  { %458 = vmatpush3.bf16.msra.mxu1 %v492_v15 }
  0x75   :  { %440 = vmatpush3.bf16.msra.mxu0 %v483_v9  ;;  %459 = vmatprep.subr.bf16.mxu1 %v493_v16 }
  0x76   :  { %441 = vmatprep.subr.bf16.mxu0 %v484_v10 }
  0x78   :  { %460 = vmatpush3.bf16.msra.mxu1 %v493_v16 }
  0x79   :  { %442 = vmatpush3.bf16.msra.mxu0 %v484_v10  ;;  %461 = vmatprep.subr.bf16.mxu1 %v494_v17 }
  0x7c   :  { %444 = vmatmul.mubr.bf16.vlgmr.msra.gmra.mrb[0].mxu0 %v486_v11  ;;  %462 = vmatpush3.bf16.msra.mxu1 %v494_v17 }
 0x14f   :  { %v445_v19 = vpop.f32.mrb[0].mxu0 }
 0x150   :  { %v216_v20 = vadd.f32 %v445_v19, %v387_v18  ;;  %v207_v21 = vpop.f32.mrb[1].mxu0 }
 0x151   :  { %v208_v22 = vadd.f32 %v387_v18, %v207_v21  ;;  %v446_v23 = vpop.f32.mrb[2].mxu0 }
 0x152   :  { %v228_v24 = vmul.f32 0.70710677, %v216_v20  ;;  %v219_v25 = vadd.f32 %v446_v23, %v387_v18  ;;  %v210_v26 = vpop.f32.mrb[3].mxu0  ;;  %v224_v37 = vmul.f32 0.5, %v216_v20 }
 0x153   :  { %v226_v27 = vmul.f32 0.70710677, %v208_v22  ;;  %v211_v28 = vadd.f32 %v387_v18, %v210_v26  ;;  %v222_v40 = vmul.f32 0.5, %v208_v22 }
 0x154   :  { %495 = verf.f32 %v228_v24  ;;  %v229_v29 = vmul.f32 0.70710677, %v219_v25  ;;  %v225_v38 = vmul.f32 0.5, %v219_v25 }
 0x155   :  { %497 = verf.f32 %v226_v27  ;;  %v227_v30 = vmul.f32 0.70710677, %v211_v28  ;;  %v223_v41 = vmul.f32 0.5, %v211_v28 }
 0x156   :  { %499 = verf.f32 %v229_v29 }
 0x157   :  { %501 = verf.f32 %v227_v30 }
 0x15e   :  { %v496_v31 = vpop.eup %495 }
 0x15f   :  { %v498_v32 = vpop.eup %497  ;;  %v236_v33 = vadd.f32 1.0, %v496_v31 }
 0x160   :  { %v500_v34 = vpop.eup %499  ;;  %v234_v35 = vadd.f32 1.0, %v498_v32 }
 0x161   :  { %v502_v36 = vpop.eup %501  ;;  %v237_v39 = vadd.f32 1.0, %v500_v34  ;;  %v240_v43 = vmul.f32 %v236_v33, %v224_v37 }
 0x162   :  { %v235_v42 = vadd.f32 1.0, %v502_v36  ;;  %v238_v45 = vmul.f32 %v234_v35, %v222_v40 }
 0x163   :  { %v241_v44 = vmul.f32 %v237_v39, %v225_v38 }
 0x164   :  { %v239_v46 = vmul.f32 %v235_v42, %v223_v41 }
 0x165   :  { %v243_v47 = vpack.c.bf16 %v241_v44, %v240_v43 }
 0x166   :  { %v242_v48 = vpack.c.bf16 %v239_v46, %v238_v45 }
 0x168   :  { %463 = vmatprep.mubr.bf16.mxu1 %v242_v48 }
 0x169   :  { %464 = vmatmul.mubr.bf16.vlgmr.msra.gmra.mrb[0].mxu1 %v243_v47 }
 0x23c   :  { %v465_v50 = vpop.f32.mrb[0].mxu1 }
 0x23d   :  { %v358_v51 = vadd.f32 %v465_v50, %v398_v49  ;;  %v349_v52 = vpop.f32.mrb[1].mxu1 }
 0x23e   :  { %v350_v53 = vadd.f32 %v398_v49, %v349_v52  ;;  %v466_v54 = vpop.f32.mrb[2].mxu1 }
 0x23f   :  { %366 = vst [vmem:[#allocation11 + $0x10] sm:$0xff] %v358_v51  ;;  %v361_v55 = vadd.f32 %v466_v54, %v398_v49  ;;  %v352_v56 = vpop.f32.mrb[3].mxu1 }
 0x240   :  { %364 = vst [vmem:[#allocation11] sm:$0xff] %v350_v53  ;;  %v353_v57 = vadd.f32 %v398_v49, %v352_v56 }
 0x241   :  { %367 = vst [vmem:[#allocation11 + $0x18] sm:$0xff] %v361_v55 }
 0x242   :  { %365 = vst [vmem:[#allocation11 + $0x8] sm:$0xff] %v353_v57 }
 0x243   :  { %624 = shalt.err (!%p621_p2)
}
 0x244   :  { %s625_s7 = scalar_lea.hbm %s776_s5, 512 }
 0x245   :  { %p626_p3 = scmp.ne.s32.totalorder %s776_s5, %s625_s7  ;;  %p629_p4 = scmp.lt.u32.totalorder %s625_s7, %s776_s5 }
 0x247   :  { %p631_p5 = pnand %p629_p4, %p626_p3 }
 0x249   :  { %634 = shalt.err (!%p631_p5)
}
 0x24a   :  { %s651_s12 = smov 128   ;;  %s652_s13 = smov 8  }
 0x24b   :  { %379 = dma.vmem_to_hbm [thread:$0]  %s374_s28, 512, %s776_s5, [#allocation4], %s651_s12, %s651_s12, %s652_s13  }
 0x24c   :  { %641 = dma.done.wait [#allocation4], 512  }
 0x24d   :  { %642 = vsyncadd [#allocation4], 4294966784 }
 0x24e   :  { %383 = vsyncpa [#allocation3], 1 }
 0x24f   :  { %384 = vsyncpa [#allocation6], 1 }
 0x250   :  { %385 = vsyncpa [#allocation9], 1 }
 0x251   :  { %386 = vsyncpa [#allocation4], 1 }

</bundles_post_ra>
